<compile_context>
chip_gen: v6e
topology: v6e:2x2x1
jax: 0.10.0
libtpu: 0.0.40
codegen_flags: <defaults>
</compile_context>

<pallas_src>
import math

import jax
import jax.numpy as jnp
import numpy as np
from jax.experimental import pallas as pl
from jax.experimental.pallas import tpu as pltpu


def _round_up(x, m):
    return (x + m - 1) // m * m


def _make_fuse_kernel(num_feats, expand_slot, offsets, sizes, pad_slices):
    """out = W_pad @ concat_i(expand_i(x_i)) + b, built entirely in VMEM.

    expand_slot[i] : index into the replication-matrix refs, or None when
                     feature i is already at the target resolution.
    offsets/sizes  : sublane offset / channel count of feature i inside the
                     (Cpad_tot, t_hw) scratch (offsets are multiples of 8).
    pad_slices     : scratch rows that are weight padding; they must be zeroed
                     (uninitialized VMEM may hold NaNs and 0 * NaN = NaN).
    """
    num_expand = sum(1 for s in expand_slot if s is not None)

    def kernel(*refs):
        x_refs = refs[:num_feats]
        e_refs = refs[num_feats:num_feats + num_expand]
        w_ref = refs[num_feats + num_expand]
        b_ref = refs[num_feats + num_expand + 1]
        o_ref = refs[num_feats + num_expand + 2]
        xcat = refs[num_feats + num_expand + 3]          # VMEM scratch

        cdt = xcat.dtype
        t_hw = xcat.shape[1]

        # Zero only the (few) padding rows of the scratch.
        for lo, hi in pad_slices:
            xcat[lo:hi, :] = jnp.zeros((hi - lo, t_hw), cdt)

        # Gather every channel group (upsampled on the fly) into the scratch.
        for i in range(num_feats):
            x = x_refs[i][...]                            # (C_i, src_tile_i)
            slot = expand_slot[i]
            if slot is not None:
                # Nearest upsample as a matmul with a 0/1 replication matrix:
                # exact selection, runs on the MXU, no in-kernel reshapes.
                x = jnp.dot(x, e_refs[slot][...],
                            preferred_element_type=jnp.float32).astype(cdt)
            off, c = offsets[i], sizes[i]
            xcat[off:off + c, :] = x

        # Single MXU matmul for the fused 1x1 conv; f32 accumulate + f32 bias.
        acc = jnp.dot(w_ref[...], xcat[...], preferred_element_type=jnp.float32)
        o_ref[...] = (acc + b_ref[...].astype(jnp.float32)).astype(o_ref.dtype)

    return kernel


def _nearest_resize_gather(x, target_hw):
    """Wrapper-side fallback for non-integer / downsample ratios.
    Matches F.interpolate(mode='nearest'): src = floor(dst * in / out)."""
    # TODO(synk): at real sizes move the row/col index tables into SMEM via
    # PrefetchScalarGridSpec and gather the needed source rows inside the
    # kernel instead of materializing this resized intermediate in HBM.
    _, _, h, w = x.shape
    th, tw = target_hw
    rows = (jnp.arange(th) * h) // th
    cols = (jnp.arange(tw) * w) // tw
    return x[:, :, rows[:, None], cols[None, :]]


def _replication_matrix(rows_per_tile, tw, src_w, sh, sw, dtype):
    """E[s, d] = 1 iff local destination position d (row-major over
    rows_per_tile x tw) reads local source position s (row-major over
    (rows_per_tile // sh) x src_w). Matches nearest with integer factors."""
    src_rows = rows_per_tile // sh
    t_hw = rows_per_tile * tw
    d = np.arange(t_hw)
    src = (d // tw // sh) * src_w + (d % tw) // sw
    e = np.zeros((src_rows * src_w, t_hw), dtype=np.float32)
    e[src, d] = 1.0
    return jnp.asarray(e, dtype=dtype)


def multi_scale_attention_fusion(attn_features, weight, bias, *,
                                 compute_dtype=None, lane_tile=2048,
                                 vmem_act_budget=12 << 20):
    """attn_features: list of NCHW arrays (first defines the target size);
    weight: (OC, sum(C_i), 1, 1); bias: (OC,). Returns (N, OC, TH, TW)."""
    th, tw = (int(s) for s in attn_features[0].shape[2:])
    hw = th * tw
    n = attn_features[0].shape[0]
    oc = weight.shape[0]
    cdt = jnp.dtype(compute_dtype) if compute_dtype is not None \
        else jnp.dtype(attn_features[0].dtype)
    cdt_bytes = cdt.itemsize
    w2d = weight.reshape(oc, -1)

    # ---- Classify features: same-resolution vs integer-factor upsample. ----
    groups = []                       # (x_flat (N,C,S), w_slice (OC,C), kind)
    off = 0
    for f in attn_features:
        c, fh, fw = f.shape[1], f.shape[2], f.shape[3]
        w_slice = w2d[:, off:off + c]
        off += c
        if (fh, fw) == (th, tw):
            kind = None
        elif th % fh == 0 and tw % fw == 0 and (th > fh or tw > fw):
            kind = (th // fh, tw // fw, fh, fw)          # (sh, sw, h, w)
        else:
            f = _nearest_resize_gather(f, (th, tw))       # rare fallback path
            fh, fw = th, tw
            kind = None
        groups.append((f.reshape(n, c, fh * fw).astype(cdt), w_slice, kind))

    # ---- Spatial tiling: whole output rows per step, 128-aligned lanes. ----
    # Row granularity L makes every source block rectangular with a lane width
    # that is a multiple of 128 (otherwise we use one full-extent tile).
    row_factors = [128 // math.gcd(tw, 128)]              # output & same-res
    for _, _, kind in groups:
        if kind is not None:
            sh, _sw, _h, w = kind
            row_factors.append(sh * (128 // math.gcd(w, 128)))
    lcm = 1
    for fct in row_factors:
        lcm = math.lcm(lcm, fct)
    # VMEM budget: ~2x (double-buffered) activations in + out per output column.
    ctot = sum(g[0].shape[1] for g in groups)
    bytes_per_col = 2 * (ctot + oc) * cdt_bytes
    lane_tile = max(128, min(int(lane_tile), vmem_act_budget // max(bytes_per_col, 1)))
    rows_per_tile = (max(1, lane_tile // tw) // lcm) * lcm
    if rows_per_tile <= 0 or rows_per_tile >= th:
        rows_per_tile = th                                 # single spatial tile
    t_hw = rows_per_tile * tw
    n_hw_tiles = pl.cdiv(hw, t_hw)
    grid = (n, n_hw_tiles)

    # ---- Build inputs / specs / packed weight. ----
    inputs, in_specs = [], []
    e_inputs, e_specs = [], []
    expand_slot, offsets, sizes, pad_slices, src_tiles = [], [], [], [], []
    w_cols = []
    cpad_off = 0
    for x, w_slice, kind in groups:
        c = x.shape[1]
        if kind is None:
            src_tile = t_hw
            expand_slot.append(None)
        else:
            sh, sw, _h, w = kind
            src_tile = (rows_per_tile // sh) * w
            e = _replication_matrix(rows_per_tile, tw, w, sh, sw, cdt)
            expand_slot.append(len(e_inputs))
            e_inputs.append(e)
            e_specs.append(pl.BlockSpec(e.shape, lambda i, j: (0, 0)))
        inputs.append(x)
        in_specs.append(pl.BlockSpec((None, c, src_tile), lambda i, j: (i, 0, j)))
        src_tiles.append(src_tile)
        # Channel-group layout in the scratch: 8-aligned sublane offsets so
        # every store is a clean (masked) sublane store.
        offsets.append(cpad_off)
        sizes.append(c)
        cpad = _round_up(c, 8)
        if cpad > c:
            pad_slices.append((cpad_off + c, cpad_off + cpad))
        w_cols.append(w_slice)
        if cpad > c:
            w_cols.append(jnp.zeros((oc, cpad - c), w_slice.dtype))
        cpad_off += cpad
    cpad_tot = cpad_off

    w_padded = jnp.concatenate(w_cols, axis=1).astype(cdt)     # (OC, Cpad_tot)
    bias_col = bias.reshape(oc, 1).astype(jnp.float32)

    all_inputs = inputs + e_inputs + [w_padded, bias_col]
    all_specs = in_specs + e_specs + [
        pl.BlockSpec((oc, cpad_tot), lambda i, j: (0, 0)),
        pl.BlockSpec((oc, 1), lambda i, j: (0, 0)),
    ]
    out_spec = pl.BlockSpec((None, oc, t_hw), lambda i, j: (i, 0, j))

    # Explicit VMEM limit: scoped default is only 16 MiB (v5e) / 32 MiB
    # (v6e/v7x); keep the request below v7x's 64 MiB physical VMEM.
    est = 2 * cdt_bytes * (sum(c * s for c, s in zip(sizes, src_tiles)) + oc * t_hw)
    est += sum(int(np.prod(e.shape)) for e in e_inputs) * cdt_bytes
    est += (cpad_tot * t_hw + oc * cpad_tot) * cdt_bytes + 4 * oc
    vmem_limit = int(min(max(2 * est + (16 << 20), 32 << 20), 48 << 20))

    kernel = _make_fuse_kernel(len(groups), expand_slot, offsets, sizes, pad_slices)

    out = pl.pallas_call(
        kernel,
        out_shape=jax.ShapeDtypeStruct((n, oc, hw), cdt),
        grid_spec=pltpu.PrefetchScalarGridSpec(
            num_scalar_prefetch=0,
            grid=grid,
            in_specs=all_specs,
            out_specs=out_spec,
            scratch_shapes=[pltpu.VMEM((cpad_tot, t_hw), cdt)],
        ),
        compiler_params=pltpu.CompilerParams(
            dimension_semantics=("parallel", "parallel"),
            vmem_limit_bytes=vmem_limit,
        ),
    )(*all_inputs)

    return out.reshape(n, oc, th, tw)


if __name__ == "__main__":
    key = jax.random.PRNGKey(0)
    k1, k2, k3, kw, kb = jax.random.split(key, 5)

    in_channels_list = [4, 8, 4]
    out_channels = 8
    batch = 2

    # Multi-scale attention features (NCHW); the first defines the target size.
    feat0 = jax.random.normal(k1, (batch, 4, 16, 16), jnp.float32)
    feat1 = jax.random.normal(k2, (batch, 8, 8, 8), jnp.float32)   # 2x upsample in-kernel
    feat2 = jax.random.normal(k3, (batch, 4, 16, 16), jnp.float32)
    attn_features = [feat0, feat1, feat2]

    ctot = sum(in_channels_list)
    weight = jax.random.normal(kw, (out_channels, ctot, 1, 1), jnp.float32) * 0.1
    bias = jax.random.normal(kb, (out_channels,), jnp.float32) * 0.1

    # Pure-JAX reference (F.interpolate nearest == floor(dst * in / out) gather).
    def ref_forward(feats, w, b):
        rth, rtw = feats[0].shape[2:]

        def nearest(x):
            _, _, h, wd = x.shape
            rows = (jnp.arange(rth) * h) // rth
            cols = (jnp.arange(rtw) * wd) // rtw
            return x[:, :, rows[:, None], cols[None, :]]

        fused = jnp.concatenate([nearest(f) for f in feats], axis=1)
        return (jnp.einsum("nchw,oc->nohw", fused, w.reshape(out_channels, -1),
                           precision=jax.lax.Precision.HIGHEST)
                + b.reshape(1, out_channels, 1, 1))

    ref = ref_forward(attn_features, weight, bias)

    # f32 run.
    out = multi_scale_attention_fusion(attn_features, weight, bias)
    out = jax.block_until_ready(out)
    assert out.shape == (batch, out_channels, 16, 16)
    assert out.dtype == jnp.float32
    assert jnp.allclose(out, ref, atol=5e-3, rtol=5e-3), \
        float(jnp.max(jnp.abs(out - ref)))

    # bf16 run (halves HBM bytes in this HBM-bound kernel); looser tolerance.
    out_bf16 = multi_scale_attention_fusion(attn_features, weight, bias,
                                            compute_dtype=jnp.bfloat16)
    out_bf16 = jax.block_until_ready(out_bf16)
    assert out_bf16.dtype == jnp.bfloat16
    assert jnp.allclose(out_bf16.astype(jnp.float32), ref, atol=5e-2, rtol=5e-2), \
        float(jnp.max(jnp.abs(out_bf16.astype(jnp.float32) - ref)))

    print("KERNEL_OK")
</pallas_src>

<mosaic_0001>
module attributes {stable_mosaic.version = 11 : i64} {
  func.func @kernel(%arg0: i32, %arg1: i32, %arg2: memref<1x4x256xf32, #tpu.memory_space<vmem>>, %arg3: memref<1x8x64xf32, #tpu.memory_space<vmem>>, %arg4: memref<1x4x256xf32, #tpu.memory_space<vmem>>, %arg5: memref<64x256xf32, #tpu.memory_space<vmem>>, %arg6: memref<8x24xf32, #tpu.memory_space<vmem>>, %arg7: memref<8x1xf32, #tpu.memory_space<vmem>>, %arg8: memref<1x8x256xf32, #tpu.memory_space<vmem>>, %arg9: memref<24x256xf32, #tpu.memory_space<vmem>>) attributes {dimension_semantics = [#tpu.dimension_semantics<parallel>, #tpu.dimension_semantics<parallel>], iteration_bounds = array<i64: 2, 1>, scalar_prefetch = 0 : i64, scratch_operands = 1 : i64, tpu.core_type = #tpu.core_type<tc>, window_params = [{transform_indices = @transform_0, window_bounds = array<i64: 1, 4, 256>}, {transform_indices = @transform_1, window_bounds = array<i64: 1, 8, 64>}, {transform_indices = @transform_2, window_bounds = array<i64: 1, 4, 256>}, {pipeline_mode = #tpu.pipeline_mode<synchronous>, transform_indices = @transform_3, window_bounds = array<i64: 64, 256>}, {pipeline_mode = #tpu.pipeline_mode<synchronous>, transform_indices = @transform_4, window_bounds = array<i64: 8, 24>}, {pipeline_mode = #tpu.pipeline_mode<synchronous>, transform_indices = @transform_5, window_bounds = array<i64: 8, 1>}, {transform_indices = @transform_6, window_bounds = array<i64: 1, 8, 256>}]} {
    %cst = arith.constant 0.000000e+00 : f32
    %0 = vector.broadcast %cst : f32 to vector<4x256xf32>
    %c4 = arith.constant 4 : index
    %c0 = arith.constant 0 : index
    %1 = vector.load %arg9[%c4, %c0] : memref<24x256xf32, #tpu.memory_space<vmem>>, vector<4x256xf32>
    tpu.vector_store %arg9[%c4, %c0], %0 {strides = array<i32>} : memref<24x256xf32, #tpu.memory_space<vmem>>, vector<4x256xf32>,
    %cst_0 = arith.constant 0.000000e+00 : f32
    %2 = vector.broadcast %cst_0 : f32 to vector<4x256xf32>
    %c20 = arith.constant 20 : index
    %c0_1 = arith.constant 0 : index
    %3 = vector.load %arg9[%c20, %c0_1] : memref<24x256xf32, #tpu.memory_space<vmem>>, vector<4x256xf32>
    tpu.vector_store %arg9[%c20, %c0_1], %2 {strides = array<i32>} : memref<24x256xf32, #tpu.memory_space<vmem>>, vector<4x256xf32>,
    %c0_2 = arith.constant 0 : index
    %c0_3 = arith.constant 0 : index
    %c0_4 = arith.constant 0 : index
    %4 = vector.load %arg2[%c0_2, %c0_3, %c0_4] : memref<1x4x256xf32, #tpu.memory_space<vmem>>, vector<1x4x256xf32>
    %5 = vector.shape_cast %4 : vector<1x4x256xf32> to vector<4x256xf32>
    %c0_5 = arith.constant 0 : index
    %c0_6 = arith.constant 0 : index
    %6 = vector.load %arg9[%c0_5, %c0_6] : memref<24x256xf32, #tpu.memory_space<vmem>>, vector<4x256xf32>
    tpu.vector_store %arg9[%c0_5, %c0_6], %5 {strides = array<i32>} : memref<24x256xf32, #tpu.memory_space<vmem>>, vector<4x256xf32>,
    %c0_7 = arith.constant 0 : index
    %c0_8 = arith.constant 0 : index
    %c0_9 = arith.constant 0 : index
    %7 = vector.load %arg3[%c0_7, %c0_8, %c0_9] : memref<1x8x64xf32, #tpu.memory_space<vmem>>, vector<1x8x64xf32>
    %8 = vector.shape_cast %7 : vector<1x8x64xf32> to vector<8x64xf32>
    %c0_10 = arith.constant 0 : index
    %c0_11 = arith.constant 0 : index
    %9 = vector.load %arg5[%c0_10, %c0_11] : memref<64x256xf32, #tpu.memory_space<vmem>>, vector<64x256xf32>
    %cst_12 = arith.constant dense<0.000000e+00> : vector<8x256xf32>
    %10 = tpu.matmul %8, %9, %cst_12 {dimension_numbers = #tpu.dot_dimension_numbers<[1], [0], [0], [1], [0, 0, 1, 1], [], []>} : vector<8x64xf32>, vector<64x256xf32>, vector<8x256xf32> -> vector<8x256xf32>
    %c8 = arith.constant 8 : index
    %c0_13 = arith.constant 0 : index
    %11 = vector.load %arg9[%c8, %c0_13] : memref<24x256xf32, #tpu.memory_space<vmem>>, vector<8x256xf32>
    tpu.vector_store %arg9[%c8, %c0_13], %10 {strides = array<i32>} : memref<24x256xf32, #tpu.memory_space<vmem>>, vector<8x256xf32>,
    %c0_14 = arith.constant 0 : index
    %c0_15 = arith.constant 0 : index
    %c0_16 = arith.constant 0 : index
    %12 = vector.load %arg4[%c0_14, %c0_15, %c0_16] : memref<1x4x256xf32, #tpu.memory_space<vmem>>, vector<1x4x256xf32>
    %13 = vector.shape_cast %12 : vector<1x4x256xf32> to vector<4x256xf32>
    %c16 = arith.constant 16 : index
    %c0_17 = arith.constant 0 : index
    %14 = vector.load %arg9[%c16, %c0_17] : memref<24x256xf32, #tpu.memory_space<vmem>>, vector<4x256xf32>
    tpu.vector_store %arg9[%c16, %c0_17], %13 {strides = array<i32>} : memref<24x256xf32, #tpu.memory_space<vmem>>, vector<4x256xf32>,
    %c0_18 = arith.constant 0 : index
    %c0_19 = arith.constant 0 : index
    %15 = vector.load %arg6[%c0_18, %c0_19] : memref<8x24xf32, #tpu.memory_space<vmem>>, vector<8x24xf32>
    %c0_20 = arith.constant 0 : index
    %c0_21 = arith.constant 0 : index
    %16 = vector.load %arg9[%c0_20, %c0_21] : memref<24x256xf32, #tpu.memory_space<vmem>>, vector<24x256xf32>
    %cst_22 = arith.constant dense<0.000000e+00> : vector<8x256xf32>
    %17 = tpu.matmul %15, %16, %cst_22 {dimension_numbers = #tpu.dot_dimension_numbers<[1], [0], [0], [1], [0, 0, 1, 1], [], []>} : vector<8x24xf32>, vector<24x256xf32>, vector<8x256xf32> -> vector<8x256xf32>
    %c0_23 = arith.constant 0 : index
    %c0_24 = arith.constant 0 : index
    %18 = vector.load %arg7[%c0_23, %c0_24] : memref<8x1xf32, #tpu.memory_space<vmem>>, vector<8x1xf32>
    %19 = vector.broadcast %18 : vector<8x1xf32> to vector<8x256xf32>
    %20 = arith.addf %17, %19 : vector<8x256xf32>
    %c0_25 = arith.constant 0 : index
    %c0_26 = arith.constant 0 : index
    %c0_27 = arith.constant 0 : index
    %21 = vector.load %arg8[%c0_25, %c0_26, %c0_27] : memref<1x8x256xf32, #tpu.memory_space<vmem>>, vector<1x8x256xf32>
    %22 = vector.shape_cast %21 : vector<1x8x256xf32> to vector<8x256xf32>
    %23 = vector.shape_cast %20 : vector<8x256xf32> to vector<1x8x256xf32>
    tpu.vector_store %arg8[%c0_25, %c0_26, %c0_27], %23 {strides = array<i32>} : memref<1x8x256xf32, #tpu.memory_space<vmem>>, vector<1x8x256xf32>,
    return
  }
  func.func @transform_0(%arg0: i32, %arg1: i32) -> (i32, i32, i32) {
    %c0_i32 = arith.constant 0 : i32
    %c0_i32_0 = arith.constant 0 : i32
    return %arg0, %c0_i32, %arg1 : i32, i32, i32
  }
  func.func @transform_1(%arg0: i32, %arg1: i32) -> (i32, i32, i32) {
    %c0_i32 = arith.constant 0 : i32
    %c0_i32_0 = arith.constant 0 : i32
    return %arg0, %c0_i32, %arg1 : i32, i32, i32
  }
  func.func @transform_2(%arg0: i32, %arg1: i32) -> (i32, i32, i32) {
    %c0_i32 = arith.constant 0 : i32
    %c0_i32_0 = arith.constant 0 : i32
    return %arg0, %c0_i32, %arg1 : i32, i32, i32
  }
  func.func @transform_3(%arg0: i32, %arg1: i32) -> (i32, i32) {
    %c0_i32 = arith.constant 0 : i32
    %c0_i32_0 = arith.constant 0 : i32
    %c0_i32_1 = arith.constant 0 : i32
    return %c0_i32, %c0_i32_0 : i32, i32
  }
  func.func @transform_4(%arg0: i32, %arg1: i32) -> (i32, i32) {
    %c0_i32 = arith.constant 0 : i32
    %c0_i32_0 = arith.constant 0 : i32
    %c0_i32_1 = arith.constant 0 : i32
    return %c0_i32, %c0_i32_0 : i32, i32
  }
  func.func @transform_5(%arg0: i32, %arg1: i32) -> (i32, i32) {
    %c0_i32 = arith.constant 0 : i32
    %c0_i32_0 = arith.constant 0 : i32
    %c0_i32_1 = arith.constant 0 : i32
    return %c0_i32, %c0_i32_0 : i32, i32
  }
  func.func @transform_6(%arg0: i32, %arg1: i32) -> (i32, i32, i32) {
    %c0_i32 = arith.constant 0 : i32
    %c0_i32_0 = arith.constant 0 : i32
    return %arg0, %c0_i32, %arg1 : i32, i32, i32
  }
}

</mosaic_0001>

<bundles_post_ra>
// kernel: tpu_custom_call.1
= control target key start
LH: loop header
LB: loop body
LE: loop exit
PB: predicated region body
PF: predicated region fallthrough
CT: control target
= control target key end

     0   :  { %s1337_s0 = inlined_call_operand.hbm [shape: f32[2,4,256], index: 0, kind: input, shape index: {}]   ;;  %s1338_s1 = inlined_call_operand.hbm [shape: f32[2,8,64], index: 1, kind: input, shape index: {}]   ;;  %s1339_s2 = inlined_call_operand.hbm [shape: f32[2,4,256], index: 2, kind: input, shape index: {}]   ;;  %s1340_s3 = inlined_call_operand.hbm [shape: f32[64,256], index: 3, kind: input, shape index: {}]   ;;  %s1341_s4 = inlined_call_operand.vmem [shape: f32[8,24], index: 4, kind: input, shape index: {}]   ;;  %s1342_s5 = inlined_call_operand.vmem [shape: f32[8,1], index: 5, kind: input, shape index: {}]   ;;  %s1343_s6 = inlined_call_operand.hbm [shape: f32[2,8,256], index: 6, kind: output, shape index: {}]  }
   0x1   :  { %1352 = sst [smem:[#allocation21_spill]] %s1338_s1 }
   0x2   :  { %11 = vsyncpa [#allocation4], 0 }
   0x3   :  { %13 = vsyncpa [#allocation4 + $0x1], 0 }
   0x4   :  { %14 = vsyncpa [#allocation7], 0 }
   0x5   :  { %16 = vsyncpa [#allocation7 + $0x1], 0 }
   0x6   :  { %17 = vsyncpa [#allocation10], 0 }
   0x7   :  { %18 = vsyncpa [#allocation5], 0 }
   0x8   :  { %20 = vsyncpa [#allocation5 + $0x1], 0  ;;  %s1104_s21 = smov 0   ;;  %s1106_s22 = smov 0  }
   0x9   :  { %s1108_s23 = smov 0   ;;  %s1110_s24 = smov 0  }
   0xa   :  { %s1112_s25 = smov 0   ;;  %s1114_s26 = smov 0  }
   0xb LB: > { %1353 = sst [smem:[#allocation16_spill]] %s1054_s25  ;;  %s38_s27 = sadd.s32 1, %s1054_s25  ;;  %s1058_s26 = sphi %s1114_s26, %s26_s26   ;;  %s1054_s25 = sphi %s1112_s25, %s1376_s25   ;;  %s1050_s24 = sphi %s1110_s24, %s1375_s24   ;;  %s1046_s23 = sphi %s1108_s23, %s1379_s23   ;;  %s1042_s22 = sphi %s1106_s22, %s1378_s22   ;;  %s1038_s21 = sphi %s1104_s21, %s1377_s21  }
   0xc   : > { %1354 = sst [smem:[#allocation17_spill]] %s1058_s26  ;;  %s47_s28 = sadd.s32 1, %s1046_s23 }
   0xd   : > { %p40_p0 = scmp.ge.s32.totalorder %s38_s27, 2  ;;  %p54_p1 = scmp.ne.s32.totalorder %s1046_s23, %s1042_s22 }
   0xe   : > { %p55_p2 = scmp.eq.s32.totalorder %s1058_s26, 0  ;;  %p801_p5 = scmp.lt.s32.totalorder %s1058_s26, 2 }
   0xf   : > { %s1381_s27 = smov (%p40_p0, %s38_s27), 0  ;;  %s1344_s30 = sand.u32 1, %s1046_s23  }
  0x10   : > { %1355 = sst [smem:[#allocation18_spill]] %s1381_s27  ;;  %p56_p4 = por %p55_p2, %p54_p1 }
  0x11   : > { %s42_s29 = ssub.s32 %s1054_s25, %s1381_s27  ;;  %s1151_s7 = sshll.u32 %s1344_s30, 3 }
  0x12   : > { %p45_p6 = scmp.eq.s32.totalorder %s42_s29, 0  ;;  %s1154_s8 = sshll.u32 %s1054_s25, 7 }
  0x13   : > { %p1156_p7 = pnand %p801_p5, %p56_p4  ;;  %s271_s11 = sand.u32 1, %s1058_s26  }
  0x14   : > { %s1161_s10 = scalar_select %p45_p6, %s1046_s23, %s47_s28  }
  0x15   : > { %s1358_s1 = sld [smem:[#allocation21_spill]]  ;;  %s275_s15 = scalar_lea.vmem [#allocation6], %s1151_s7 }
  0x16   : > { %1357 = sst [smem:[#allocation19_spill]] %s1161_s10  ;;  %s283_s16 = sshll.u32 %s275_s15, 4  ;;  %s284_s16 = int_to_ptr.vmem [resolvable:$true] %s283_s16 }
  0x17   : > { %s1169_s17 = scalar_lea.sflag [#allocation7], %s271_s11  ;;  %p1346_p8 = pneg %p1156_p7 }
  0x18   : > { %s873_s18 = scalar_lea.vmem %s284_s16, 128  ;;  %s1060_s19 = smov [#allocation6]  }
  0x19   : > { %p874_p9 = scmp.ne.s32.totalorder %s284_s16, %s873_s18  ;;  %s878_s20 = sshll.u32 %s1060_s19, 4  ;;  %s879_s20 = int_to_ptr.vmem [resolvable:$false] %s878_s20 }
  0x1a   : > { %s880_s28 = scalar_lea.vmem %s879_s20, 256  ;;  %p881_p12 = scmp.lt.s32.totalorder %s284_s16, %s879_s20 }
  0x1b   : > { %s281_s14 = scalar_lea.hbm %s1358_s1, %s1154_s8  ;;  %p876_p10 = pnand %p874_p9, %p1346_p8 }
  0x1c   : > { %p882_p13 = scmp.lt.s32.totalorder %s880_s28, %s873_s18 }
  0x1d   : > { %p877_p11 = pneg %p876_p10 }
  0x1e   : > { %p883_p0 = por %p882_p13, %p881_p12 }
  0x20   : > { %p884_p2 = pnand %p883_p0, %p877_p11 }
  0x22   : > { %887 = shalt.err (!%p884_p2)
}
  0x23   : > { %792 = dma.hbm_to_vmem [thread:$0]  (!%p1156_p7), %s281_s14, 128, %s284_s16, %s1169_s17  }
  0x24   : > { %s1180_s29 = sadd.s32 4294967295, %s1058_s26   ;;  %s742_s11 = sadd.s32 4294967294, %s1058_s26  }
  0x25   : > { %p60_p4 = scmp.ne.s32.totalorder %s1042_s22, %s1038_s21  ;;  %p1345_p5 = scmp.eq.s32.totalorder %s1180_s29, 0 }
  0x26   : > { %p205_p6 = scmp.eq.s32.totalorder %s1180_s29, 1  ;;  %p211_p9 = scmp.eq.s32.totalorder %s742_s11, 1 }
  0x27   : > { %p743_p10 = scmp.ge.s32.totalorder %s1058_s26, 1  ;;  %p1190_p11 = por %p1345_p5, %p60_p4 }
  0x28   : > { %p1197_p12 = por %p205_p6, %p54_p1  ;;  %p1201_p13 = por %p211_p9, %p60_p4 }
  0x29   : > { %p218_p0 = scmp.lt.s32.totalorder %s1058_s26, 3  ;;  %s1061_s16 = smov [#allocation9]  }
  0x2a   : > { %s1361_s14 = scalar_select %p1201_p13, 1, 0 }
  0x2b   : > { %p1206_p2 = pnand %p743_p10, %p218_p0  ;;  %s230_s18 = sshll.u32 %s1061_s16, 4  ;;  %s231_s18 = int_to_ptr.vmem [resolvable:$true] %s230_s18 }
  0x2c   : > { %1362 = sst [smem:[#allocation20_spill]] %s1361_s14  ;;  %s254_s30 = scalar_lea.vmem [#allocation3], %s1151_s7 }
  0x2d   : > { %p782_p3 = pneg %p1206_p2  ;;  %s264_s1 = sshll.u32 %s254_s30, 4  ;;  %s1223_s1 = int_to_ptr.vmem [resolvable:$true] %s264_s1 }
  0x2e   : > { %s899_s16 = scalar_lea.vmem %s231_s18, 2048  ;;  %p907_p0 = scmp.lt.s32.totalorder %s231_s18, %s231_s18 }
  0x2f   : > { %p1214_p1 = pnand %p782_p3, %p1345_p5  ;;  %p900_p6 = scmp.ne.s32.totalorder %s231_s18, %s899_s16 }
  0x30   : > { %p908_p3 = scmp.lt.s32.totalorder %s899_s16, %s899_s16 }
  0x31   : > { %p890_p4 = pneg %p1214_p1 }
  0x32   : > { %p909_p5 = por %p908_p3, %p907_p0 }
  0x33   : > { %p902_p9 = pnand %p900_p6, %p890_p4 }
  0x35   : > { %p903_p10 = pneg %p902_p9 }
  0x37   : > { %p910_p8 = pnand %p909_p5, %p903_p10 }
  0x39   : > { %913 = shalt.err (!%p910_p8)
}
  0x3a   : > { %s1062_s27 = smov 256   ;;  %s1063_s30 = smov 16  }
  0x3b   : > { %785 = dma.hbm_to_vmem [thread:$0]  (!%p1214_p1), %s1340_s3, 2048, %s231_s18, [#allocation10], %s1062_s27, %s1062_s27, %s1063_s30  }
  0x3c   : > { %s1365_s11 = sand.u32 1, %s1046_s23   ;;  %s927_s10 = scalar_lea.vmem %s1223_s1, 128 }
  0x3d   : > { %s251_s25 = scalar_lea.sflag [#allocation4], %s1365_s11  ;;  %p928_p4 = scmp.ne.s32.totalorder %s1223_s1, %s927_s10 }
  0x3e   : > { %p1366_p5 = pneg %p1156_p7  ;;  %s1064_s16 = smov [#allocation3]  }
  0x3f   : > { %s932_s26 = sshll.u32 %s1064_s16, 4  ;;  %s933_s26 = int_to_ptr.vmem [resolvable:$false] %s932_s26 }
  0x40   : > { %p930_p8 = pnand %p928_p4, %p1366_p5  ;;  %s934_s14 = scalar_lea.vmem %s933_s26, 256 }
  0x41   : > { %p935_p9 = scmp.lt.s32.totalorder %s1223_s1, %s933_s26  ;;  %p936_p10 = scmp.lt.s32.totalorder %s934_s14, %s927_s10 }
  0x42   : > { %p931_p6 = pneg %p930_p8 }
  0x43   : > { %p937_p0 = por %p936_p10, %p935_p9 }
  0x45   : > { %p938_p3 = pnand %p937_p0, %p931_p6 }
  0x47   : > { %941 = shalt.err (!%p938_p3)
}
  0x48   : > { %s1367_s19 = scalar_lea.hbm %s1337_s0, %s1154_s8  ;;  %s302_s26 = scalar_lea.hbm %s1339_s2, %s1154_s8 }
  0x49   : > { %789 = dma.hbm_to_vmem [thread:$0]  (!%p1156_p7), %s1367_s19, 128, %s1223_s1, %s251_s25  }
  0x4a   : > { %s294_s10 = scalar_lea.vmem [#allocation8], %s1151_s7  ;;  %p1368_p4 = pmov %p1366_p5 }
  0x4b   : > { %s304_s14 = sshll.u32 %s294_s10, 4  ;;  %s1065_s28 = smov [#allocation8]   ;;  %s305_s14 = int_to_ptr.vmem [resolvable:$true] %s304_s14 }
  0x4c   : > { %s955_s20 = scalar_lea.vmem %s305_s14, 128  ;;  %s960_s16 = sshll.u32 %s1065_s28, 4  ;;  %s961_s16 = int_to_ptr.vmem [resolvable:$false] %s960_s16 }
  0x4d   : > { %p956_p1 = scmp.ne.s32.totalorder %s305_s14, %s955_s20  ;;  %s962_s27 = scalar_lea.vmem %s961_s16, 256 }
  0x4e   : > { %p963_p6 = scmp.lt.s32.totalorder %s305_s14, %s961_s16  ;;  %p964_p9 = scmp.lt.s32.totalorder %s962_s27, %s955_s20 }
  0x4f   : > { %p958_p5 = pnand %p956_p1, %p1368_p4 }
  0x50   : > { %p965_p10 = por %p964_p9, %p963_p6 }
  0x51   : > { %p959_p8 = pneg %p958_p5 }
  0x53   : > { %p966_p0 = pnand %p965_p10, %p959_p8 }
  0x55   : > { %969 = shalt.err (!%p966_p0)
}
  0x56   : > { %795 = dma.hbm_to_vmem [thread:$0]  (!%p1156_p7), %s302_s26, 128, %s305_s14, %s1169_s17  }
  0x57   : > { %313 = sbr.rel (%p1206_p2) target bundleno = 526 (0x20e), region = 44  ;;  %s1262_s1 = sand.u32 (!%p1206_p2), 1, %s1042_s22  }
  0x58   : > { %s1265_s25 = sshll.u32 (!%p1206_p2), %s1262_s1, 3  ;;  %s316_s7 = scalar_lea.sflag (!%p1206_p2), [#allocation4], %s1262_s1 }
  0x59   : > { %s319_s8 = scalar_lea.vmem (!%p1206_p2), [#allocation3], %s1265_s25 }
  0x5c   : > { %1021 = dma.done.wait (%p1190_p11), %s316_s7, 128  }
  0x5d   : > { %1023 = vsyncadd (%p1190_p11), %s316_s7, 4294967168  ;;  %s324_s9 = sand.u32 1, %s1180_s29   ;;  %s328_s15 = scalar_lea.vmem [#allocation6], %s1265_s25 }
  0x5e   : > { %s325_s17 = scalar_lea.sflag [#allocation7], %s324_s9 }
  0x5f   : > { %1025 = dma.done.wait (%p1190_p11), %s325_s17, 256  }
  0x60   : > { %1027 = vsyncadd (%p1190_p11), %s325_s17, 4294967040  ;;  %s337_s18 = scalar_lea.vmem [#allocation8], %s1265_s25  ;;  %p1369_p7 = scmp.eq.s32.totalorder %s1180_s29, 0 }
  0x62   : > { %1029 = dma.done.wait (%p1369_p7), [#allocation10], 2048   ;;  %p1370_p2 = pmov %p1369_p7 }
  0x63   : > { %v1066_v0 = vmov 0.0   ;;  %v409_v1 = vld [vmem:[#allocation9 + $0x78] sm:$0xff]  ;;  %v408_v2 = vld [vmem:[#allocation9 + $0x70] sm:$0xff]  ;;  %v407_v3 = vld [vmem:[#allocation9 + $0x68] sm:$0xff]  ;;  %vm410_vm0 = vcmask 523264   ;;  %v1067_v25 = vmov 0  }
  0x64   : > { %1031 = vsyncadd (%p1370_p2), [#allocation10], 4294965248  ;;  %383 = vst [vmem:[#allocation2 + $0x18] sm:$0xf0] %v1066_v0  ;;  %478 = vmatprep.mubr.f32.mxu0 %v1066_v0  ;;  %574 = vmatprep.mubr.f32.mxu1 %v1066_v0  ;;  %v406_v4 = vld [vmem:[#allocation9 + $0x60] sm:$0xff]  ;;  %v405_v5 = vld [vmem:[#allocation9 + $0x58] sm:$0xff] }
  0x65   : > { %384 = vst [vmem:[#allocation2 + $0x20] sm:$0xf0] %v1066_v0  ;;  %385 = vst [vmem:[#allocation2 + $0x8] sm:$0xf0] %v1066_v0  ;;  %430 = vmatprep.subr.mxu0 %v409_v1  ;;  %v404_v6 = vld [vmem:[#allocation9 + $0x50] sm:$0xff]  ;;  %v403_v7 = vld [vmem:[#allocation9 + $0x48] sm:$0xff]  ;;  %857 = vset.pattern.permute.xlu0 %v1067_v25 }
  0x66   : > { %386 = vst [vmem:[#allocation2] sm:$0xf0] %v1066_v0  ;;  %431 = vmatpush1.msra.mxu0 %v408_v2  ;;  %v402_v8 = vld [vmem:[#allocation9 + $0x40] sm:$0xff]  ;;  %v401_v9 = vld [vmem:[#allocation9 + $0x38] sm:$0xff]  ;;  %v400_v10 = vld [vmem:[#allocation9 + $0x30] sm:$0xff]  ;;  %vm506_vm1 = vcmask 195584  }
  0x67   : > { %432 = vmatprep.subr.mxu0 %v407_v3  ;;  %v399_v11 = vld [vmem:[#allocation9 + $0x28] sm:$0xff]  ;;  %v398_v12 = vld [vmem:[#allocation9 + $0x20] sm:$0xff]  ;;  %v397_v13 = vld [vmem:[#allocation9 + $0x18] sm:$0xff]  ;;  %s759_s30 = sshll.u32 %s1262_s1, 4  ;;  %s769_s26 = sshll.u32 %s1050_s24, 8 }
  0x68   : > { %433 = vmatpush1.msra.mxu0 %v406_v4  ;;  %v396_v14 = vld [vmem:[#allocation9 + $0x10] sm:$0xff]  ;;  %v395_v15 = vld [vmem:[#allocation9 + $0x8] sm:$0xff]  ;;  %v394_v16 = vld [vmem:[#allocation9] sm:$0xff]  ;;  %s379_s10 = scalar_lea.vmem [#allocation11], %s759_s30  ;;  %s598_s16 = scalar_lea.hbm %s1343_s6, %s769_s26 }
  0x69   : > { %434 = vmatprep.subr.mxu0 %v405_v5  ;;  %v393_v17 = vld [vmem:[%s328_s15] sm:$0xff]  ;;  %v487_v18 = vld [vmem:[%s337_s18] sm:$0xff]  ;;  %s600_s14 = sshll.u32 %s379_s10, 4  ;;  %s584_s27 = scalar_lea.sflag [#allocation5], %s1262_s1  ;;  %s601_s14 = int_to_ptr.vmem [resolvable:$true] %s600_s14 }
  0x6a   : > { %435 = vmatpush1.msra.mxu0 %v404_v6  ;;  %v489_v19 = vcombine.high %v487_v18, %v487_v18  ;;  %491 = vst [vmem:[#allocation2 + $0x8] sm:$0xf] %v487_v18  ;;  %v387_v20 = vld [vmem:[%s319_s8] sm:$0xff]  ;;  %v500_v24 = vld [vmem:[%s1342_s5] sm:$0xff]  ;;  %s970_s25 = scalar_lea.vmem %s601_s14, 256  ;;  %s1068_s7 = smov [#allocation11]  }
  0x6b   : > { %436 = vmatprep.subr.mxu0 %v403_v7  ;;  %v389_v21 = vcombine.high %v387_v20, %v387_v20  ;;  %391 = vst [vmem:[#allocation2 + $0x18] sm:$0xf] %v387_v20  ;;  %503 = vperm.xlu0 %857, %v500_v24   ;;  %v493_v30 = vld [vmem:[%s1341_s4] sm:$0xff]  ;;  %p971_p11 = scmp.ne.s32.totalorder %s601_s14, %s970_s25  ;;  %s974_s24 = sshll.u32 %s1068_s7, 4  ;;  %s975_s24 = int_to_ptr.vmem [resolvable:$false] %s974_s24 }
  0x6c   : > { %437 = vmatpush1.msra.mxu0 %v402_v8  ;;  %492 = vst [vmem:[#allocation2] sm:$0xf] %v489_v19  ;;  %s976_s8 = scalar_lea.vmem %s975_s24, 512  ;;  %p977_p4 = scmp.lt.s32.totalorder %s601_s14, %s975_s24 }
  0x6d   : > { %438 = vmatprep.subr.mxu0 %v401_v9  ;;  %392 = vst [vmem:[#allocation2 + $0x20] sm:$0xf] %v389_v21  ;;  %p972_p3 = pnand %p971_p11, %p1197_p12  ;;  %p978_p5 = scmp.lt.s32.totalorder %s976_s8, %s970_s25 }
  0x6e   : > { %439 = vmatpush1.msra.mxu0 %v400_v10 }
  0x6f   : > { %440 = vmatprep.subr.mxu0 %v399_v11  ;;  %p973_p1 = pneg %p972_p3  ;;  %p979_p8 = por %p978_p5, %p977_p4 }
  0x70   : > { %441 = vmatpush1.msra.mxu0 %v398_v12 }
  0x71   : > { %442 = vmatprep.subr.mxu0 %v397_v13  ;;  %v498_v23 = vld [vmem:[#allocation2 + $0x8] sm:$0xff]  ;;  %p980_p6 = pnand %p979_p8, %p973_p1 }
  0x72   : > { %443 = vmatpush1.msra.mxu0 %v396_v14  ;;  %v494_v29 = vld [vmem:[#allocation2 + $0x18] sm:$0xff] }
  0x73   : > { %444 = vmatprep.subr.mxu0 %v395_v15  ;;  %v499_v22 = vld [vmem:[#allocation2] sm:$0xff] }
  0x74   : > { %445 = vmatpush1.msra.mxu0 %v394_v16  ;;  %536 = vmatprep.subr.mxu1 %v499_v22  ;;  %v495_v28 = vld [vmem:[#allocation2 + $0x20] sm:$0xff] }
  0x75   : > { %760 = vmatmul.mubr.msk.f32.vlgmr.msra.gmra.mxu0 %vm410_vm0, %v393_v17  ;;  %537 = vmatpush1.msra.mxu1 %v498_v23 }
  0xe6   : > { %v504_v31 = vpop.permute.xlu0 %503 }
 0x135   : > { %v480_v26 = vpop.f32.mrf.mxu0 }
 0x137   : > { %v482_v27 = vpop.f32.mrf.mxu0 }
 0x138   : > { %538 = vmatprep.subr.mxu1 %v482_v27 }
 0x139   : > { %539 = vmatpush1.msra.mxu1 %v480_v26 }
 0x13a   : > { %540 = vmatprep.subr.mxu1 %v495_v28 }
 0x13b   : > { %541 = vmatpush1.msra.mxu1 %v494_v29 }
 0x13c   : > { %761 = vmatmul.mubr.msk.f32.vlgmr.msra.gmra.mxu1 %vm506_vm1, %v493_v30 }
 0x1fc   : > { %v576_v32 = vpop.f32.mrf.mxu1 }
 0x1fd   : > { %v577_v33 = vadd.f32 %v576_v32, %v504_v31 }
 0x1fe   : > { %v578_v34 = vpop.f32.mrf.mxu1 }
 0x1ff   : > { %581 = vst [vmem:[%s379_s10] sm:$0xff] %v577_v33  ;;  %v579_v35 = vadd.f32 %v578_v34, %v504_v31 }
 0x201   : > { %582 = vst [vmem:[%s379_s10 + $0x8] sm:$0xff] %v579_v35 }
 0x202   : > { %983 = shalt.err (!%p980_p6)
}
 0x203   : > { %s984_s9 = scalar_lea.hbm %s598_s16, 256  ;;  %s988_s15 = scalar_lea.hbm %s1343_s6, 512 }
 0x204   : > { %p985_p9 = scmp.ne.s32.totalorder %s598_s16, %s984_s9  ;;  %p989_p7 = scmp.lt.s32.totalorder %s598_s16, %s1343_s6 }
 0x205   : > { %p990_p2 = scmp.lt.s32.totalorder %s988_s15, %s984_s9 }
 0x206   : > { %p986_p10 = pnand %p985_p9, %p1197_p12 }
 0x207   : > { %p991_p11 = por %p990_p2, %p989_p7 }
 0x208   : > { %p987_p0 = pneg %p986_p10 }
 0x20a   : > { %p992_p3 = pnand %p991_p11, %p987_p0 }
 0x20c   : > { %995 = shalt.err (!%p992_p3)
}
 0x20d   : > { %780 = dma.vmem_to_hbm [thread:$0]  (%p1197_p12), %s601_s14, 256, %s598_s16, %s584_s27  }
 0x20e PF: > { %s1372_s19 = sld [smem:[#allocation17_spill]]  ;;  %s612_s11 = sand.u32 1, %s1038_s21  }
 0x20f   : > { %s613_s30 = scalar_lea.sflag [#allocation5], %s612_s11 }
 0x214   : > { %p1373_p1 = scmp.ge.s32.totalorder %s1372_s19, 2 }
 0x216   : > { %p797_p4 = pnand %p1373_p1, %p1201_p13 }
 0x218   : > { %p798_p5 = pneg %p797_p4 }
 0x21a   : > { %1033 = dma.done.wait (%p798_p5), %s613_s30, 256  }
 0x21b   : > { %1035 = vsyncadd (%p798_p5), %s613_s30, 4294967040  ;;  %s26_s26 = sadd.s32 1, %s1372_s19   ;;  %s1374_s10 = sld [smem:[#allocation19_spill]] }
 0x21c   : > { %p23_p8 = scmp.ge.s32.totalorder %s26_s26, 4   ;;  %s1375_s24 = sld [smem:[#allocation16_spill]] }
 0x21d   : > { %s1376_s25 = sld [smem:[#allocation18_spill]]  ;;  %s1377_s21 = smov %s1042_s22 }
 0x21e   : > { %s1378_s22 = smov %s1046_s23  ;;  %25 = sbr.rel (!%p23_p8) target bundleno = 11 (0xb), region = 117 }
 0x221   : > { %s1379_s23 = smov %s1374_s10 }
 0x223   :  { %618 = vsyncpa [#allocation4], 1 }
 0x224   :  { %620 = vsyncpa [#allocation4 + $0x1], 1 }
 0x225   :  { %621 = vsyncpa [#allocation7], 1 }
 0x226   :  { %623 = vsyncpa [#allocation7 + $0x1], 1 }
 0x227   :  { %624 = vsyncpa [#allocation10], 1 }
 0x228   :  { %625 = vsyncpa [#allocation5], 1 }
 0x229   :  { %627 = vsyncpa [#allocation5 + $0x1], 1 }

</bundles_post_ra>
